<compile_context>
chip_gen: v7x
topology: tpu7x:2x2x1
jax: 0.10.0
libtpu: 0.0.40
codegen_flags: <defaults>
</compile_context>

<pallas_src>
import functools

import jax
import jax.numpy as jnp
from jax.experimental import pallas as pl
from jax.experimental.pallas import tpu as pltpu


def _rhythm_kernel(x_ref, w_ref, b_ref, o_ref, acc_ref, *,
                   K, T, pad, L_out, Bt, compute_dtype):
    # x_ref  : (Bt, T, C)       input tile (channels-last, unpadded)
    # w_ref  : (K, C, O)        combined depthwise*linear weights
    # b_ref  : (1, 1, O)        linear bias (f32)
    # o_ref  : (Bt, L_out, O)   output tile
    # acc_ref: (Bt, L_out, O)   f32 VMEM accumulator scratch

    # Bias folded into the accumulator init (saves a full-tile VPU add).
    acc_ref[...] = jnp.broadcast_to(b_ref[...], acc_ref.shape)

    # Depthwise conv + linear folded into per-tap matmuls.  Zero padding is
    # handled by restricting each tap to the output rows it validly touches,
    # so there is no padded scratch, no re-zero, and no VMEM->VMEM copy of x.
    for k in range(K):                      # K is small & static -> unrolled
        lo = max(0, pad - k)                # first output row touched by tap k
        hi = min(L_out, T + pad - k)        # one past the last touched row
        if hi <= lo:
            continue
        src = lo + k - pad                  # matching start row in x
        n = hi - lo
        if Bt == 1:
            lhs = x_ref[0, src:src + n, :]                       # (n, C)
            if lhs.dtype != compute_dtype:
                lhs = lhs.astype(compute_dtype)
            acc_ref[0, lo:hi, :] += jnp.dot(
                lhs, w_ref[k], preferred_element_type=jnp.float32)
        else:
            lhs = x_ref[:, src:src + n, :]                       # (Bt, n, C)
            if lhs.dtype != compute_dtype:
                lhs = lhs.astype(compute_dtype)
            # Per-batch slices are contiguous: no (Bt*n, C) reshape copy.
            acc_ref[:, lo:hi, :] += jnp.einsum(
                'blc,co->blo', lhs, w_ref[k],
                preferred_element_type=jnp.float32)

    o_ref[...] = acc_ref[...].astype(o_ref.dtype)


def _tpu_vmem_capacity():
    try:
        return int(pltpu.get_tpu_info().vmem_capacity_bytes)
    except Exception:
        return 64 * 1024 * 1024   # conservative default (v7x-class)


def _pick_bt(B, L_out, T, C, O, itemsize, *, target_rows, vmem_budget):
    """Largest batch block that (a) leaves >= 2 grid steps when B >= 2,
    (b) stays under the row target, and (c) fits a lane/sublane-padded VMEM
    estimate (the C/O axes occupy full 128-lane rows in VMEM)."""
    lane_pad = lambda n: -(-n // 128) * 128
    sub_pad = lambda n: -(-n // 8) * 8
    c_pad, o_pad = lane_pad(C), lane_pad(O)
    bt_cap = B if B < 2 else B // 2
    best = 1
    for d in range(1, bt_cap + 1):
        if B % d:
            continue
        rows = d * L_out
        x_bytes = 2 * d * sub_pad(T) * c_pad * itemsize        # in block, 2-buffered
        out_bytes = 2 * d * sub_pad(L_out) * o_pad * itemsize  # out block, 2-buffered
        acc_bytes = d * sub_pad(L_out) * o_pad * 4             # f32 accumulator
        if rows <= max(target_rows, L_out) and \
                x_bytes + out_bytes + acc_bytes <= vmem_budget:
            best = d
    return best


def learnable_rhythm_forward(x, w_dw, w_lin, b_lin, *, period, compute_dtype=None):
    """x: (B, T, C); w_dw: (C, 1, K) torch layout; w_lin: (O, C); b_lin: (O,)."""
    B, T, C = x.shape
    O = w_lin.shape[0]
    K = period
    pad = K // 2
    L_out = T + 2 * pad - K + 1          # exact torch Conv1d output length

    cdt = jnp.dtype(compute_dtype) if compute_dtype is not None else jnp.dtype(x.dtype)

    # Fold the depthwise conv into the linear weight (tiny XLA-side prep):
    #   W_comb[k, c, o] = w_dw[c, 0, k] * w_lin[o, c]
    wdw_t = jnp.transpose(w_dw[:, 0, :], (1, 0))                    # (K, C)
    wlin_t = jnp.transpose(w_lin, (1, 0))                           # (C, O)
    w_comb = (wdw_t[:, :, None] * wlin_t[None, :, :]).astype(cdt)   # (K, C, O)
    bias = b_lin.reshape(1, 1, O).astype(jnp.float32)

    # Generation-aware limits (128 MiB VMEM parts vs v7x's 64 MiB).
    cap = _tpu_vmem_capacity()
    if cap >= 96 * 1024 * 1024:          # v5e / v6e class
        vmem_limit, pick_budget, target_rows = 64 << 20, 24 << 20, 1024
    else:                                # v7x class
        vmem_limit, pick_budget, target_rows = 48 << 20, 16 << 20, 512

    Bt = _pick_bt(B, L_out, T, C, O, jnp.dtype(x.dtype).itemsize,
                  target_rows=target_rows, vmem_budget=pick_budget)
    grid = (B // Bt,)

    kernel = functools.partial(_rhythm_kernel, K=K, T=T, pad=pad,
                               L_out=L_out, Bt=Bt, compute_dtype=cdt)

    cost = pl.CostEstimate(
        flops=2 * B * L_out * K * C * O + B * L_out * O,
        transcendentals=0,
        bytes_accessed=int(x.size) * x.dtype.itemsize
                       + int(w_comb.size) * jnp.dtype(cdt).itemsize
                       + O * 4
                       + B * L_out * O * x.dtype.itemsize)

    out = pl.pallas_call(
        kernel,
        out_shape=jax.ShapeDtypeStruct((B, L_out, O), x.dtype),
        grid_spec=pltpu.PrefetchScalarGridSpec(
            num_scalar_prefetch=0,
            grid=grid,
            in_specs=[
                pl.BlockSpec((Bt, T, C), lambda i: (i, 0, 0)),
                pl.BlockSpec((K, C, O), lambda i: (0, 0, 0)),
                pl.BlockSpec((1, 1, O), lambda i: (0, 0, 0)),
            ],
            out_specs=pl.BlockSpec((Bt, L_out, O), lambda i: (i, 0, 0)),
            scratch_shapes=[pltpu.VMEM((Bt, L_out, O), jnp.float32)],
        ),
        compiler_params=pltpu.CompilerParams(
            dimension_semantics=("parallel",),
            vmem_limit_bytes=vmem_limit),
        cost_estimate=cost,
    )(x, w_comb, bias)

    return out                                    # already (B, L_out, O)


def _reference(x, w_dw, w_lin, b_lin, *, period):
    """Pure-JAX reference mirroring the torch module."""
    B, T, C = x.shape
    K = period
    pad = K // 2
    L_out = T + 2 * pad - K + 1
    x_pad = jnp.pad(x, ((0, 0), (pad, pad), (0, 0)))
    conv = jnp.zeros((B, L_out, C), jnp.float32)
    for k in range(K):
        conv = conv + x_pad[:, k:k + L_out, :] * w_dw[:, 0, k][None, None, :]
    return conv @ w_lin.T + b_lin


if __name__ == "__main__":
    # Small shapes consistent with the module's forward: (batch, seq, input_dim)
    B, T = 2, 16
    input_dim, output_dim, period = 8, 16, 5

    key = jax.random.PRNGKey(0)
    kx, kw1, kw2, kb = jax.random.split(key, 4)

    x = jax.random.normal(kx, (B, T, input_dim), dtype=jnp.float32)
    # Deterministic synthetic parameters (torch shapes):
    #   Conv1d depthwise weight: (C, 1, K); Linear weight: (O, C); bias: (O,)
    w_dw = jax.random.normal(kw1, (input_dim, 1, period), dtype=jnp.float32) * 0.3
    w_lin = jax.random.normal(kw2, (output_dim, input_dim), dtype=jnp.float32) * 0.2
    b_lin = jax.random.normal(kb, (output_dim,), dtype=jnp.float32) * 0.1

    out = learnable_rhythm_forward(x, w_dw, w_lin, b_lin, period=period)
    out = jax.block_until_ready(out)

    ref = _reference(x, w_dw, w_lin, b_lin, period=period)
    assert out.shape == ref.shape, (out.shape, ref.shape)
    assert jnp.allclose(out, ref, atol=2e-4, rtol=2e-4), float(
        jnp.max(jnp.abs(out - ref)))

    print("KERNEL_OK")
</pallas_src>

<mosaic_0001>
module attributes {stable_mosaic.version = 11 : i64} {
  func.func @_rhythm_kernel(%arg0: i32, %arg1: memref<1x16x8xf32, #tpu.memory_space<vmem>>, %arg2: memref<5x8x16xf32, #tpu.memory_space<vmem>>, %arg3: memref<1x1x16xf32, #tpu.memory_space<vmem>>, %arg4: memref<1x16x16xf32, #tpu.memory_space<vmem>>, %arg5: memref<1x16x16xf32, #tpu.memory_space<vmem>>) attributes {dimension_semantics = [#tpu.dimension_semantics<parallel>], iteration_bounds = array<i64: 2>, scalar_prefetch = 0 : i64, scratch_operands = 1 : i64, tpu.core_type = #tpu.core_type<tc>, window_params = [{transform_indices = @transform_0, window_bounds = array<i64: 1, 16, 8>}, {pipeline_mode = #tpu.pipeline_mode<synchronous>, transform_indices = @transform_1, window_bounds = array<i64: 5, 8, 16>}, {pipeline_mode = #tpu.pipeline_mode<synchronous>, transform_indices = @transform_2, window_bounds = array<i64: 1, 1, 16>}, {transform_indices = @transform_3, window_bounds = array<i64: 1, 16, 16>}]} {
    %c0 = arith.constant 0 : index
    %c0_0 = arith.constant 0 : index
    %c0_1 = arith.constant 0 : index
    %0 = vector.load %arg3[%c0, %c0_0, %c0_1] : memref<1x1x16xf32, #tpu.memory_space<vmem>>, vector<1x1x16xf32>
    %1 = vector.shape_cast %0 : vector<1x1x16xf32> to vector<1x1x16xf32>
    %2 = vector.broadcast %1 : vector<1x1x16xf32> to vector<1x16x16xf32>
    %c0_2 = arith.constant 0 : index
    %c0_3 = arith.constant 0 : index
    %c0_4 = arith.constant 0 : index
    %3 = vector.load %arg5[%c0_2, %c0_3, %c0_4] : memref<1x16x16xf32, #tpu.memory_space<vmem>>, vector<1x16x16xf32>
    tpu.vector_store %arg5[%c0_2, %c0_3, %c0_4], %2 {strides = array<i32>} : memref<1x16x16xf32, #tpu.memory_space<vmem>>, vector<1x16x16xf32>,
    %c0_5 = arith.constant 0 : index
    %c0_6 = arith.constant 0 : index
    %c0_7 = arith.constant 0 : index
    %4 = vector.load %arg1[%c0_5, %c0_6, %c0_7] : memref<1x16x8xf32, #tpu.memory_space<vmem>>, vector<1x14x8xf32>
    %5 = vector.shape_cast %4 : vector<1x14x8xf32> to vector<14x8xf32>
    %c0_8 = arith.constant 0 : index
    %c2 = arith.constant 2 : index
    %c0_9 = arith.constant 0 : index
    %6 = vector.load %arg5[%c0_8, %c2, %c0_9] : memref<1x16x16xf32, #tpu.memory_space<vmem>>, vector<1x14x16xf32>
    %7 = vector.shape_cast %6 : vector<1x14x16xf32> to vector<14x16xf32>
    %c0_10 = arith.constant 0 : index
    %c0_11 = arith.constant 0 : index
    %c0_12 = arith.constant 0 : index
    %8 = vector.load %arg2[%c0_10, %c0_11, %c0_12] : memref<5x8x16xf32, #tpu.memory_space<vmem>>, vector<1x8x16xf32>
    %9 = vector.shape_cast %8 : vector<1x8x16xf32> to vector<8x16xf32>
    %cst = arith.constant dense<0.000000e+00> : vector<14x16xf32>
    %10 = tpu.matmul %5, %9, %cst {dimension_numbers = #tpu.dot_dimension_numbers<[1], [0], [0], [1], [0, 0, 1, 1], [], []>} : vector<14x8xf32>, vector<8x16xf32>, vector<14x16xf32> -> vector<14x16xf32>
    %11 = arith.addf %7, %10 : vector<14x16xf32>
    %c0_13 = arith.constant 0 : index
    %c2_14 = arith.constant 2 : index
    %c0_15 = arith.constant 0 : index
    %12 = vector.load %arg5[%c0_13, %c2_14, %c0_15] : memref<1x16x16xf32, #tpu.memory_space<vmem>>, vector<1x14x16xf32>
    %13 = vector.shape_cast %12 : vector<1x14x16xf32> to vector<14x16xf32>
    %14 = vector.shape_cast %11 : vector<14x16xf32> to vector<1x14x16xf32>
    tpu.vector_store %arg5[%c0_13, %c2_14, %c0_15], %14 {strides = array<i32>} : memref<1x16x16xf32, #tpu.memory_space<vmem>>, vector<1x14x16xf32>,
    %c0_16 = arith.constant 0 : index
    %c0_17 = arith.constant 0 : index
    %c0_18 = arith.constant 0 : index
    %15 = vector.load %arg1[%c0_16, %c0_17, %c0_18] : memref<1x16x8xf32, #tpu.memory_space<vmem>>, vector<1x15x8xf32>
    %16 = vector.shape_cast %15 : vector<1x15x8xf32> to vector<15x8xf32>
    %c0_19 = arith.constant 0 : index
    %c1 = arith.constant 1 : index
    %c0_20 = arith.constant 0 : index
    %17 = vector.load %arg5[%c0_19, %c1, %c0_20] : memref<1x16x16xf32, #tpu.memory_space<vmem>>, vector<1x15x16xf32>
    %18 = vector.shape_cast %17 : vector<1x15x16xf32> to vector<15x16xf32>
    %c1_21 = arith.constant 1 : index
    %c0_22 = arith.constant 0 : index
    %c0_23 = arith.constant 0 : index
    %19 = vector.load %arg2[%c1_21, %c0_22, %c0_23] : memref<5x8x16xf32, #tpu.memory_space<vmem>>, vector<1x8x16xf32>
    %20 = vector.shape_cast %19 : vector<1x8x16xf32> to vector<8x16xf32>
    %cst_24 = arith.constant dense<0.000000e+00> : vector<15x16xf32>
    %21 = tpu.matmul %16, %20, %cst_24 {dimension_numbers = #tpu.dot_dimension_numbers<[1], [0], [0], [1], [0, 0, 1, 1], [], []>} : vector<15x8xf32>, vector<8x16xf32>, vector<15x16xf32> -> vector<15x16xf32>
    %22 = arith.addf %18, %21 : vector<15x16xf32>
    %c0_25 = arith.constant 0 : index
    %c1_26 = arith.constant 1 : index
    %c0_27 = arith.constant 0 : index
    %23 = vector.load %arg5[%c0_25, %c1_26, %c0_27] : memref<1x16x16xf32, #tpu.memory_space<vmem>>, vector<1x15x16xf32>
    %24 = vector.shape_cast %23 : vector<1x15x16xf32> to vector<15x16xf32>
    %25 = vector.shape_cast %22 : vector<15x16xf32> to vector<1x15x16xf32>
    tpu.vector_store %arg5[%c0_25, %c1_26, %c0_27], %25 {strides = array<i32>} : memref<1x16x16xf32, #tpu.memory_space<vmem>>, vector<1x15x16xf32>,
    %c0_28 = arith.constant 0 : index
    %c0_29 = arith.constant 0 : index
    %c0_30 = arith.constant 0 : index
    %26 = vector.load %arg1[%c0_28, %c0_29, %c0_30] : memref<1x16x8xf32, #tpu.memory_space<vmem>>, vector<1x16x8xf32>
    %27 = vector.shape_cast %26 : vector<1x16x8xf32> to vector<16x8xf32>
    %c0_31 = arith.constant 0 : index
    %c0_32 = arith.constant 0 : index
    %c0_33 = arith.constant 0 : index
    %28 = vector.load %arg5[%c0_31, %c0_32, %c0_33] : memref<1x16x16xf32, #tpu.memory_space<vmem>>, vector<1x16x16xf32>
    %29 = vector.shape_cast %28 : vector<1x16x16xf32> to vector<16x16xf32>
    %c2_34 = arith.constant 2 : index
    %c0_35 = arith.constant 0 : index
    %c0_36 = arith.constant 0 : index
    %30 = vector.load %arg2[%c2_34, %c0_35, %c0_36] : memref<5x8x16xf32, #tpu.memory_space<vmem>>, vector<1x8x16xf32>
    %31 = vector.shape_cast %30 : vector<1x8x16xf32> to vector<8x16xf32>
    %cst_37 = arith.constant dense<0.000000e+00> : vector<16x16xf32>
    %32 = tpu.matmul %27, %31, %cst_37 {dimension_numbers = #tpu.dot_dimension_numbers<[1], [0], [0], [1], [0, 0, 1, 1], [], []>} : vector<16x8xf32>, vector<8x16xf32>, vector<16x16xf32> -> vector<16x16xf32>
    %33 = arith.addf %29, %32 : vector<16x16xf32>
    %c0_38 = arith.constant 0 : index
    %c0_39 = arith.constant 0 : index
    %c0_40 = arith.constant 0 : index
    %34 = vector.load %arg5[%c0_38, %c0_39, %c0_40] : memref<1x16x16xf32, #tpu.memory_space<vmem>>, vector<1x16x16xf32>
    %35 = vector.shape_cast %34 : vector<1x16x16xf32> to vector<16x16xf32>
    %36 = vector.shape_cast %33 : vector<16x16xf32> to vector<1x16x16xf32>
    tpu.vector_store %arg5[%c0_38, %c0_39, %c0_40], %36 {strides = array<i32>} : memref<1x16x16xf32, #tpu.memory_space<vmem>>, vector<1x16x16xf32>,
    %c0_41 = arith.constant 0 : index
    %c1_42 = arith.constant 1 : index
    %c0_43 = arith.constant 0 : index
    %37 = vector.load %arg1[%c0_41, %c1_42, %c0_43] : memref<1x16x8xf32, #tpu.memory_space<vmem>>, vector<1x15x8xf32>
    %38 = vector.shape_cast %37 : vector<1x15x8xf32> to vector<15x8xf32>
    %c0_44 = arith.constant 0 : index
    %c0_45 = arith.constant 0 : index
    %c0_46 = arith.constant 0 : index
    %39 = vector.load %arg5[%c0_44, %c0_45, %c0_46] : memref<1x16x16xf32, #tpu.memory_space<vmem>>, vector<1x15x16xf32>
    %40 = vector.shape_cast %39 : vector<1x15x16xf32> to vector<15x16xf32>
    %c3 = arith.constant 3 : index
    %c0_47 = arith.constant 0 : index
    %c0_48 = arith.constant 0 : index
    %41 = vector.load %arg2[%c3, %c0_47, %c0_48] : memref<5x8x16xf32, #tpu.memory_space<vmem>>, vector<1x8x16xf32>
    %42 = vector.shape_cast %41 : vector<1x8x16xf32> to vector<8x16xf32>
    %cst_49 = arith.constant dense<0.000000e+00> : vector<15x16xf32>
    %43 = tpu.matmul %38, %42, %cst_49 {dimension_numbers = #tpu.dot_dimension_numbers<[1], [0], [0], [1], [0, 0, 1, 1], [], []>} : vector<15x8xf32>, vector<8x16xf32>, vector<15x16xf32> -> vector<15x16xf32>
    %44 = arith.addf %40, %43 : vector<15x16xf32>
    %c0_50 = arith.constant 0 : index
    %c0_51 = arith.constant 0 : index
    %c0_52 = arith.constant 0 : index
    %45 = vector.load %arg5[%c0_50, %c0_51, %c0_52] : memref<1x16x16xf32, #tpu.memory_space<vmem>>, vector<1x15x16xf32>
    %46 = vector.shape_cast %45 : vector<1x15x16xf32> to vector<15x16xf32>
    %47 = vector.shape_cast %44 : vector<15x16xf32> to vector<1x15x16xf32>
    tpu.vector_store %arg5[%c0_50, %c0_51, %c0_52], %47 {strides = array<i32>} : memref<1x16x16xf32, #tpu.memory_space<vmem>>, vector<1x15x16xf32>,
    %c0_53 = arith.constant 0 : index
    %c2_54 = arith.constant 2 : index
    %c0_55 = arith.constant 0 : index
    %48 = vector.load %arg1[%c0_53, %c2_54, %c0_55] : memref<1x16x8xf32, #tpu.memory_space<vmem>>, vector<1x14x8xf32>
    %49 = vector.shape_cast %48 : vector<1x14x8xf32> to vector<14x8xf32>
    %c0_56 = arith.constant 0 : index
    %c0_57 = arith.constant 0 : index
    %c0_58 = arith.constant 0 : index
    %50 = vector.load %arg5[%c0_56, %c0_57, %c0_58] : memref<1x16x16xf32, #tpu.memory_space<vmem>>, vector<1x14x16xf32>
    %51 = vector.shape_cast %50 : vector<1x14x16xf32> to vector<14x16xf32>
    %c4 = arith.constant 4 : index
    %c0_59 = arith.constant 0 : index
    %c0_60 = arith.constant 0 : index
    %52 = vector.load %arg2[%c4, %c0_59, %c0_60] : memref<5x8x16xf32, #tpu.memory_space<vmem>>, vector<1x8x16xf32>
    %53 = vector.shape_cast %52 : vector<1x8x16xf32> to vector<8x16xf32>
    %cst_61 = arith.constant dense<0.000000e+00> : vector<14x16xf32>
    %54 = tpu.matmul %49, %53, %cst_61 {dimension_numbers = #tpu.dot_dimension_numbers<[1], [0], [0], [1], [0, 0, 1, 1], [], []>} : vector<14x8xf32>, vector<8x16xf32>, vector<14x16xf32> -> vector<14x16xf32>
    %55 = arith.addf %51, %54 : vector<14x16xf32>
    %c0_62 = arith.constant 0 : index
    %c0_63 = arith.constant 0 : index
    %c0_64 = arith.constant 0 : index
    %56 = vector.load %arg5[%c0_62, %c0_63, %c0_64] : memref<1x16x16xf32, #tpu.memory_space<vmem>>, vector<1x14x16xf32>
    %57 = vector.shape_cast %56 : vector<1x14x16xf32> to vector<14x16xf32>
    %58 = vector.shape_cast %55 : vector<14x16xf32> to vector<1x14x16xf32>
    tpu.vector_store %arg5[%c0_62, %c0_63, %c0_64], %58 {strides = array<i32>} : memref<1x16x16xf32, #tpu.memory_space<vmem>>, vector<1x14x16xf32>,
    %c0_65 = arith.constant 0 : index
    %c0_66 = arith.constant 0 : index
    %c0_67 = arith.constant 0 : index
    %59 = vector.load %arg5[%c0_65, %c0_66, %c0_67] : memref<1x16x16xf32, #tpu.memory_space<vmem>>, vector<1x16x16xf32>
    %c0_68 = arith.constant 0 : index
    %c0_69 = arith.constant 0 : index
    %c0_70 = arith.constant 0 : index
    %60 = vector.load %arg4[%c0_68, %c0_69, %c0_70] : memref<1x16x16xf32, #tpu.memory_space<vmem>>, vector<1x16x16xf32>
    tpu.vector_store %arg4[%c0_68, %c0_69, %c0_70], %59 {strides = array<i32>} : memref<1x16x16xf32, #tpu.memory_space<vmem>>, vector<1x16x16xf32>,
    return
  }
  func.func @transform_0(%arg0: i32) -> (i32, i32, i32) {
    %c0_i32 = arith.constant 0 : i32
    %c0_i32_0 = arith.constant 0 : i32
    %c0_i32_1 = arith.constant 0 : i32
    return %arg0, %c0_i32, %c0_i32_0 : i32, i32, i32
  }
  func.func @transform_1(%arg0: i32) -> (i32, i32, i32) {
    %c0_i32 = arith.constant 0 : i32
    %c0_i32_0 = arith.constant 0 : i32
    %c0_i32_1 = arith.constant 0 : i32
    %c0_i32_2 = arith.constant 0 : i32
    return %c0_i32, %c0_i32_0, %c0_i32_1 : i32, i32, i32
  }
  func.func @transform_2(%arg0: i32) -> (i32, i32, i32) {
    %c0_i32 = arith.constant 0 : i32
    %c0_i32_0 = arith.constant 0 : i32
    %c0_i32_1 = arith.constant 0 : i32
    %c0_i32_2 = arith.constant 0 : i32
    return %c0_i32, %c0_i32_0, %c0_i32_1 : i32, i32, i32
  }
  func.func @transform_3(%arg0: i32) -> (i32, i32, i32) {
    %c0_i32 = arith.constant 0 : i32
    %c0_i32_0 = arith.constant 0 : i32
    %c0_i32_1 = arith.constant 0 : i32
    return %arg0, %c0_i32, %c0_i32_0 : i32, i32, i32
  }
}

</mosaic_0001>

<bundles_post_ra>
// kernel: tpu_custom_call.1
= control target key start
LH: loop header
LB: loop body
LE: loop exit
PB: predicated region body
PF: predicated region fallthrough
CT: control target
= control target key end

     0   :  { %8 = vsyncpa [#allocation4], 0  ;;  %s1058_s0 = inlined_call_operand.vmem [shape: f32[2,16,8], index: 0, kind: input, shape index: {}]   ;;  %s1059_s1 = inlined_call_operand.vmem [shape: f32[5,8,16], index: 1, kind: input, shape index: {}]   ;;  %s1060_s2 = inlined_call_operand.vmem [shape: f32[1,1,16], index: 2, kind: input, shape index: {}]   ;;  %s1061_s3 = inlined_call_operand.hbm [shape: f32[2,16,16], index: 3, kind: output, shape index: {}]  }
   0x1   :  { %10 = vsyncpa [#allocation4 + $0x1], 0  ;;  %s913_s12 = smov 0   ;;  %s915_s13 = smov 0  }
   0x2   :  { %s917_s14 = smov 0   ;;  %s919_s15 = smov 0  }
   0x3 LB: > { %s934_s16 = sadd.s32 4294967295, %s888_s15   ;;  %s716_s17 = sadd.s32 4294967294, %s888_s15   ;;  %s888_s15 = sphi %s919_s15, %s1067_s15   ;;  %s884_s14 = sphi %s917_s14, %s1066_s14   ;;  %s880_s13 = sphi %s915_s13, %s1065_s13   ;;  %s876_s12 = sphi %s913_s12, %s1064_s12  }
   0x4   : > { %s938_s18 = sadd.s32 1, %s888_s15   ;;  %s91_s19 = sadd.s32 1, %s884_s14 }
   0x5   : > { %s88_s20 = ssub.s32 %s888_s15, %s938_s18  ;;  %p101_p0 = scmp.ne.s32.totalorder %s884_s14, %s880_s13 }
   0x6   : > { %p89_p1 = scmp.eq.s32.totalorder %s88_s20, 0  ;;  %p102_p2 = scmp.eq.s32.totalorder %s934_s16, 1 }
   0x7   : > { %p107_p3 = scmp.ne.s32.totalorder %s880_s13, %s876_s12  ;;  %p108_p4 = scmp.eq.s32.totalorder %s716_s17, 1 }
   0x8   : > { %s949_s21 = scalar_select %p89_p1, %s884_s14, %s91_s19  }
   0x9   : > { %p951_p5 = por %p102_p2, %p101_p0  ;;  %p955_p6 = por %p108_p4, %p107_p3 }
   0xa   : > { %p719_p7 = scmp.ge.s32.totalorder %s888_s15, 1  ;;  %p140_p8 = scmp.lt.s32.totalorder %s888_s15, 3 }
   0xc   : > { %p141_p9 = pnand %p719_p7, %p140_p8 }
   0xd   : > { %v183_v0 = vld [vmem:[%s1059_s1] sm:$0xff] (!%p141_p9)  ;;  %p164_p10 = scmp.lt.s32.totalorder (!%p141_p9), %s934_s16, 1  ;;  %v726_v1 = vld [vmem:[%s1059_s1 + $0x8] sm:$0xff] (!%p141_p9)  ;;  %v729_v2 = vld [vmem:[%s1059_s1 + $0x10] sm:$0xff] (!%p141_p9)  ;;  %vm176_vm0 = vcmask (!%p141_p9), 130048   ;;  %vm184_vm1 = vcmask (!%p141_p9), 64512  }
   0xe   : > { %144 = sbr.rel (%p141_p9) target bundleno = 307 (0x133), region = 32  ;;  %760 = vmatprep.subr.mxu0 (!%p141_p9), %v183_v0  ;;  %765 = vmatprep.subr.mxu1 (!%p141_p9), %v726_v1  ;;  %v732_v3 = vld [vmem:[%s1059_s1 + $0x18] sm:$0xff] (!%p141_p9)  ;;  %v723_v4 = vld [vmem:[%s1060_s2] ss:$0 sm:$0xff] (!%p141_p9)  ;;  %vm269_vm2 = vcmask (!%p141_p9), 128000   ;;  %vm361_vm3 = vcmask (!%p141_p9), 129024  }
   0xf   : > { %761 = vmatpush3.msra.mxu0 (!%p141_p9), %v183_v0  ;;  %766 = vmatpush3.msra.mxu1 (!%p141_p9), %v726_v1  ;;  %177 = vst.msk [vmem:[#allocation2] sm:$0xff] (!%p141_p9), %vm176_vm0, %v723_v4  ;;  %178 = vst.msk [vmem:[#allocation2 + $0x8] sm:$0xff] (!%p141_p9), %vm176_vm0, %v723_v4  ;;  %v735_v9 = vld [vmem:[%s1059_s1 + $0x20] sm:$0xff] (!%p141_p9)  ;;  %s161_s20 = sand.u32 (!%p141_p9), 1, %s880_s13   ;;  %s744_s25 = sshll.u32 (!%p141_p9), %s934_s16, 8 }
  0x10   : > { %770 = vmatprep.subr.mxu0 (!%p141_p9), %v729_v2  ;;  %775 = vmatprep.subr.mxu1 (!%p141_p9), %v732_v3  ;;  %s720_s24 = sshll.u32 (!%p141_p9), %s161_s20, 4  ;;  %s1011_s30 = scalar_lea.hbm (!%p141_p9), %s1061_s3, %s744_s25 }
  0x11   : > { %s163_s26 = scalar_lea.vmem (!%p141_p9), [#allocation3], %s720_s24  ;;  %s1017_s4 = scalar_lea.sflag (!%p141_p9), [#allocation4], %s161_s20 }
  0x12   : > { %s654_s27 = sshll.u32 (!%p141_p9), %s163_s26, 4  ;;  %s890_s5 = smov (!%p141_p9), [#allocation3]   ;;  %s1013_s27 = int_to_ptr.vmem [resolvable:$true] %s654_s27 }
  0x13   : > { %s830_s6 = sshll.u32 (!%p141_p9), %s890_s5, 4  ;;  %s831_s6 = int_to_ptr.vmem [resolvable:$false] %s830_s6 }
  0x14   : > { %p833_p0 = scmp.lt.s32.totalorder (!%p141_p9), %s1013_s27, %s831_s6 }
  0x15   : > { %s165_s7 = scalar_select %p164_p10, %s934_s16, 1 }
  0x16   : > { %v182_v14 = vld [vmem:[#allocation2 + $0xa] sm:$0x3f]  ;;  %v181_v15 = vld [vmem:[#allocation2 + $0x2] sm:$0xff]  ;;  %s826_s16 = scalar_lea.vmem %s1013_s27, 256 }
  0x17   : > { %s743_s8 = sshll.u32 %s165_s7, 4  ;;  %p827_p11 = scmp.ne.s32.totalorder %s1013_s27, %s826_s16 }
  0x18   : > { %s168_s11 = scalar_lea.vmem %s1058_s0, %s743_s8  ;;  %s832_s7 = scalar_lea.vmem %s831_s6, 512 }
  0x19   : > { %v179_v5 = vld [vmem:[%s168_s11] sm:$0xff]  ;;  %v180_v6 = vld [vmem:[%s168_s11 + $0x8] sm:$0x3f]  ;;  %p828_p12 = pnand %p827_p11, %p951_p5  ;;  %p834_p1 = scmp.lt.s32.totalorder %s832_s7, %s826_s16 }
  0x1a   : > { %v272_v7 = vld [vmem:[%s168_s11 + $0x8] sm:$0x7f]  ;;  %762 = vmatprep.mubr.msk.f32.mxu0 %vm184_vm1, %v179_v5  ;;  %767 = vmatprep.mubr.msk.f32.mxu1 %vm184_vm1, %v179_v5 }
  0x1b   : > { %v454_v8 = vld [vmem:[%s168_s11 + $0x1] sm:$0xff]  ;;  %763 = vmatmul.mubr.msk.f32.vlgmr.msra.gmra.mrb[0].mxu0 %vm184_vm1, %v180_v6  ;;  %768 = vmatmul.mubr.msk.f32.vlgmr.msra.gmra.mrb[0].mxu1 %vm184_vm1, %v272_v7  ;;  %v455_v11 = vld [vmem:[%s168_s11 + $0x9] sm:$0x7f]  ;;  %p829_p13 = pneg %p828_p12  ;;  %p835_p2 = por %p834_p1, %p833_p0 }
  0x1c   : > { %771 = vmatpush3.msra.mxu0 %v729_v2  ;;  %772 = vmatprep.mubr.msk.f32.mxu0 %vm184_vm1, %v179_v5  ;;  %v364_v10 = vld [vmem:[%s168_s11 + $0x8] sm:$0xff] }
  0x1d   : > { %776 = vmatpush3.msra.mxu1 %v732_v3  ;;  %777 = vmatprep.mubr.msk.f32.mxu1 %vm184_vm1, %v454_v8  ;;  %v545_v12 = vld [vmem:[%s168_s11 + $0x2] sm:$0xff]  ;;  %v546_v13 = vld [vmem:[%s168_s11 + $0xa] sm:$0x3f]  ;;  %p836_p3 = pnand %p835_p2, %p829_p13 }
  0x1e   : > { %780 = vmatprep.subr.mxu0 %v735_v9 }
  0x1f   : > { %773 = vmatmul.mubr.msk.f32.vlgmr.msra.gmra.mrb[2].mxu0 %vm184_vm1, %v364_v10  ;;  %778 = vmatmul.mubr.msk.f32.vlgmr.msra.gmra.mrb[2].mxu1 %vm184_vm1, %v455_v11 }
  0x20   : > { %781 = vmatpush3.msra.mxu0 %v735_v9  ;;  %782 = vmatprep.mubr.msk.f32.mxu0 %vm184_vm1, %v545_v12 }
  0x23   : > { %783 = vmatmul.mubr.msk.f32.vlgmr.msra.gmra.mrb[4].mxu0 %vm184_vm1, %v546_v13 }
  0xee   : > { %v764_v16 = vpop.f32.mrb[0].mxu0  ;;  %v769_v17 = vpop.f32.mrb[0].mxu1 }
  0xef   : > { %v267_v18 = vadd.f32 %v764_v16, %v182_v14  ;;  %v257_v19 = vpop.f32.mrb[1].mxu0  ;;  %v349_v20 = vpop.f32.mrb[1].mxu1 }
  0xf0   : > { %v266_v21 = vadd.f32 %v257_v19, %v181_v15 }
  0xf1   : > { %270 = vst.msk [vmem:[#allocation2 + $0xa] sm:$0x3f] %vm269_vm2, %v267_v18 }
  0xf2   : > { %268 = vst.msk [vmem:[#allocation2 + $0x2] sm:$0xff] %vm176_vm0, %v266_v21  ;;  %v774_v22 = vpop.f32.mrb[2].mxu0  ;;  %v779_v23 = vpop.f32.mrb[2].mxu1 }
  0xf3   : > { %v441_v24 = vpop.f32.mrb[3].mxu0  ;;  %v532_v25 = vpop.f32.mrb[3].mxu1 }
  0xf6   : > { %v784_v26 = vpop.f32.mrb[4].mxu0 }
  0xf7   : > { %v623_v27 = vpop.f32.mrb[5].mxu0 }
  0xf9   : > { %v274_v28 = vld [vmem:[#allocation2 + $0x9] sm:$0x7f]  ;;  %v273_v29 = vld [vmem:[#allocation2 + $0x1] sm:$0xff] }
  0xfa   : > { %v359_v30 = vadd.f32 %v769_v17, %v274_v28  ;;  %v358_v31 = vadd.f32 %v349_v20, %v273_v29 }
  0xfc   : > { %362 = vst.msk [vmem:[#allocation2 + $0x9] sm:$0x7f] %vm361_vm3, %v359_v30 }
  0xfd   : > { %360 = vst.msk [vmem:[#allocation2 + $0x1] sm:$0xff] %vm176_vm0, %v358_v31 }
 0x104   : > { %v366_v32 = vld [vmem:[#allocation2 + $0x8] sm:$0xff]  ;;  %v365_v33 = vld [vmem:[#allocation2] sm:$0xff] }
 0x105   : > { %v451_v34 = vadd.f32 %v774_v22, %v366_v32  ;;  %v450_v35 = vadd.f32 %v441_v24, %v365_v33 }
 0x107   : > { %453 = vst.msk [vmem:[#allocation2 + $0x8] sm:$0xff] %vm176_vm0, %v451_v34  ;;  %452 = vst.msk [vmem:[#allocation2] sm:$0xff] %vm176_vm0, %v450_v35 }
 0x10e   : > { %v457_v36 = vld [vmem:[#allocation2 + $0x8] sm:$0x7f]  ;;  %v456_v37 = vld [vmem:[#allocation2] sm:$0xff] }
 0x10f   : > { %v542_v38 = vadd.f32 %v779_v23, %v457_v36  ;;  %v541_v39 = vadd.f32 %v532_v25, %v456_v37 }
 0x111   : > { %544 = vst.msk [vmem:[#allocation2 + $0x8] sm:$0x7f] %vm361_vm3, %v542_v38 }
 0x112   : > { %543 = vst.msk [vmem:[#allocation2] sm:$0xff] %vm176_vm0, %v541_v39 }
 0x118   : > { %v548_v40 = vld [vmem:[#allocation2 + $0x8] sm:$0x3f] }
 0x119   : > { %v547_v41 = vld [vmem:[#allocation2] sm:$0xff]  ;;  %v633_v42 = vadd.f32 %v784_v26, %v548_v40 }
 0x11a   : > { %v632_v43 = vadd.f32 %v623_v27, %v547_v41 }
 0x11b   : > { %635 = vst.msk [vmem:[#allocation2 + $0x8] sm:$0x3f] %vm269_vm2, %v633_v42 }
 0x11c   : > { %634 = vst.msk [vmem:[#allocation2] sm:$0xff] %vm176_vm0, %v632_v43 }
 0x122   : > { %v637_v45 = vld [vmem:[#allocation2 + $0x8] sm:$0xff] }
 0x123   : > { %v636_v44 = vld [vmem:[#allocation2] sm:$0xff]  ;;  %639 = vst.msk [vmem:[%s163_s26 + $0x8] sm:$0xff] %vm176_vm0, %v637_v45 }
 0x124   : > { %638 = vst.msk [vmem:[%s163_s26] sm:$0xff] %vm176_vm0, %v636_v44 }
 0x125   : > { %839 = shalt.err (!%p836_p3)
}
 0x126   : > { %s840_s8 = scalar_lea.hbm %s1011_s30, 256  ;;  %s844_s11 = scalar_lea.hbm %s1061_s3, 512 }
 0x127   : > { %p841_p4 = scmp.ne.s32.totalorder %s1011_s30, %s840_s8  ;;  %p845_p9 = scmp.lt.u32.totalorder %s1011_s30, %s1061_s3 }
 0x128   : > { %p846_p10 = scmp.lt.u32.totalorder %s844_s11, %s840_s8  ;;  %p848_p12 = scmp.lt.u32.totalorder %s840_s8, %s1011_s30 }
 0x129   : > { %p842_p7 = pnand %p841_p4, %p951_p5 }
 0x12a   : > { %p847_p11 = por %p846_p10, %p845_p9 }
 0x12b   : > { %p843_p8 = pneg %p842_p7 }
 0x12c   : > { %p849_p13 = por %p848_p12, %p847_p11 }
 0x12e   : > { %p850_p0 = pnand %p849_p13, %p843_p8 }
 0x130   : > { %853 = shalt.err (!%p850_p0)
}
 0x131   : > { %s891_s20 = smov 128   ;;  %s892_s24 = smov 8  }
 0x132   : > { %785 = dma.vmem_to_hbm [thread:$0]  (%p951_p5), %s1013_s27, 256, %s1011_s30, %s1017_s4, %s891_s20, %s891_s20, %s892_s24  }
 0x133 PF: > { %p791_p1 = scmp.ge.s32.totalorder %s888_s15, 2  ;;  %s669_s25 = sand.u32 1, %s876_s12  }
 0x134   : > { %s670_s26 = scalar_lea.sflag [#allocation4], %s669_s25 }
 0x135   : > { %p788_p2 = pnand %p791_p1, %p955_p6 }
 0x137   : > { %871 = dma.done.wait (!%p788_p2), %s670_s26, 256  }
 0x138   : > { %873 = vsyncadd (!%p788_p2), %s670_s26, 4294967040  ;;  %p13_p3 = scmp.ge.s32.totalorder %s938_s18, 4   ;;  %s1064_s12 = smov %s880_s13 }
 0x139   : > { %s1065_s13 = smov %s884_s14  ;;  %s1066_s14 = smov %s949_s21 }
 0x13a   : > { %s1067_s15 = smov %s938_s18  ;;  %15 = sbr.rel (!%p13_p3) target bundleno = 3 (0x3), region = 71 }
 0x141   :  { %675 = vsyncpa [#allocation4], 1 }
 0x142   :  { %677 = vsyncpa [#allocation4 + $0x1], 1 }

</bundles_post_ra>
